<compile_context>
chip_gen: v5e
topology: v5e:2x2
jax: 0.10.0
libtpu: 0.0.40
codegen_flags: <defaults>
</compile_context>

<pallas_src>
import jax
import jax.numpy as jnp
from jax.experimental import pallas as pl
from jax.experimental.pallas import tpu as pltpu  # noqa: F401  (kept for TPU backend)

TAU = 0.1  # temperature for the relation-map softmax


def _disc_kernel(vis_ref, txt_ref, out_ref):
    v = vis_ref[...].astype(jnp.float32)   # (Q, D)
    t = txt_ref[...].astype(jnp.float32)   # (N, D)

    q_n = v.shape[0]
    n_txt = t.shape[0]
    n_neighbors = max(n_txt - 1, 1)        # static guard for the N == 1 case
    eps = 1e-6

    # L2-normalize (cosine similarity).
    v_n = v * jax.lax.rsqrt(jnp.sum(v * v, axis=-1, keepdims=True) + eps)
    t_n = t * jax.lax.rsqrt(jnp.sum(t * t, axis=-1, keepdims=True) + eps)

    # Single fused MXU matmul: rows 0..Q-1 = visual queries, row Q = base text
    # feature (teacher).  (Q+1, D) x (N, D)^T  ->  (Q+1, N).
    lhs = jnp.concatenate([v_n, t_n[0:1, :]], axis=0)
    fused = jax.lax.dot_general(
        lhs, t_n, (((1,), (1,)), ((), ())),
        preferred_element_type=jnp.float32)

    sim_vt = fused[0:q_n, :]                # (Q, N) visual-to-text cosine sims
    rel_text_row = fused[q_n:q_n + 1, :]    # (1, N) base-text-to-text sims

    # base_sim / neighbors_sim: column-0 slice + total-minus-base (no mask).
    base_sum = jnp.sum(sim_vt[:, 0:1], keepdims=True)          # (1, 1)
    total_sum = jnp.sum(sim_vt, keepdims=True)                  # (1, 1)
    base_sim = base_sum / jnp.float32(q_n)
    neigh_sim = (total_sum - base_sum) / jnp.float32(q_n * n_neighbors)

    # Teacher relation map: softmax over base-text/text similarities.
    rel_text = rel_text_row / TAU
    rel_text = rel_text - jnp.max(rel_text, axis=-1, keepdims=True)
    logp = rel_text - jnp.log(jnp.sum(jnp.exp(rel_text), axis=-1, keepdims=True))
    p = jnp.exp(logp)                                           # (1, N)

    # Student relation map: log-softmax over visual/text similarities.
    rel_vis = sim_vt / TAU
    rel_vis = rel_vis - jnp.max(rel_vis, axis=-1, keepdims=True)
    logq = rel_vis - jnp.log(jnp.sum(jnp.exp(rel_vis), axis=-1, keepdims=True))

    # KL(P || Q_q) = -H(P) term hoisted:  sum_j p_j*(logp_j - logq_qj)
    #             = sum_j p_j*logp_j  -  sum_j p_j*logq_qj
    h = jnp.sum(p * logp, keepdims=True)                        # (1, 1)
    cross = jnp.sum(p * logq, axis=-1, keepdims=True)           # (Q, 1)
    kl = h - jnp.sum(cross, axis=0, keepdims=True) / jnp.float32(q_n)  # (1, 1)

    # Pack the three scalars into one lane-dense (1, 128) output row:
    # lane 0 = base_sim, lane 1 = neighbors_sim, lane 2 = kl_divergence.
    lane = jax.lax.broadcasted_iota(jnp.int32, (1, 128), 1)
    packed = jnp.where(lane == 0, base_sim,
                       jnp.where(lane == 1, neigh_sim, kl))
    out_ref[...] = packed


def disc_criterion(visual_feature: jax.Array, text_features: jax.Array):
    """visual_feature: [Q, D]; text_features: [N, D] (row 0 = base word)."""
    Q, D = visual_feature.shape
    N, D2 = text_features.shape
    assert D == D2
    itemsize = max(jnp.dtype(visual_feature.dtype).itemsize,
                   jnp.dtype(text_features.dtype).itemsize)

    # NOTE: if this criterion is evaluated for many images/words per step,
    # add a leading batch grid axis (dimension_semantics=("parallel",)) to
    # amortize the per-call overhead and use both TCs on v7x.
    out = pl.pallas_call(
        _disc_kernel,
        out_shape=jax.ShapeDtypeStruct((1, 128), jnp.float32),
        in_specs=[
            pl.BlockSpec((Q, D), lambda: (0, 0)),
            pl.BlockSpec((N, D), lambda: (0, 0)),
        ],
        out_specs=pl.BlockSpec((1, 128), lambda: (0, 0)),
        cost_estimate=pl.CostEstimate(
            flops=2 * (Q + 1) * N * D,
            transcendentals=2 * (Q + 1) * N,
            bytes_accessed=(Q + N) * D * itemsize + 128 * 4),
    )(visual_feature, text_features)  # native dtype; no wrapper cast

    return {
        "base_sim": out[0, 0],
        "neighbors_sim": out[0, 1],
        "kl_divergence": out[0, 2],
    }


if __name__ == "__main__":
    key = jax.random.PRNGKey(0)
    k_vis, k_txt = jax.random.split(key)

    Q, D, N = 8, 32, 8  # 8 visual query vectors, hidden 32, 1 base + 7 neighbors
    visual_feature = jax.random.normal(k_vis, (Q, D), dtype=jnp.float32)
    # Deterministic synthetic "word features" (row 0 = the queried word,
    # rows 1..N-1 = neighbor words) instead of loading .pth files.
    text_features = jax.random.normal(k_txt, (N, D), dtype=jnp.float32)

    loss_dict = disc_criterion(visual_feature, text_features)
    jax.block_until_ready(loss_dict)

    # Basic sanity: finite scalars.
    for k, v in loss_dict.items():
        assert v.shape == () and bool(jnp.isfinite(v)), (k, v)

    print("KERNEL_OK")
</pallas_src>

<mosaic_0001>
module attributes {stable_mosaic.version = 11 : i64} {
  func.func @_disc_kernel(%arg0: memref<8x32xf32, #tpu.memory_space<vmem>>, %arg1: memref<8x32xf32, #tpu.memory_space<vmem>>, %arg2: memref<1x128xf32, #tpu.memory_space<vmem>>) attributes {dimension_semantics = [], scalar_prefetch = 0 : i64, scratch_operands = 0 : i64, tpu.core_type = #tpu.core_type<tc>} {
    %c0 = arith.constant 0 : index
    %c0_0 = arith.constant 0 : index
    %0 = vector.load %arg0[%c0, %c0_0] : memref<8x32xf32, #tpu.memory_space<vmem>>, vector<8x32xf32>
    %c0_1 = arith.constant 0 : index
    %c0_2 = arith.constant 0 : index
    %1 = vector.load %arg1[%c0_1, %c0_2] : memref<8x32xf32, #tpu.memory_space<vmem>>, vector<8x32xf32>
    %2 = arith.mulf %0, %0 : vector<8x32xf32>
    %cst = arith.constant dense<0.000000e+00> : vector<8xf32>
    %3 = vector.multi_reduction <add>, %2, %cst [1] : vector<8x32xf32> to vector<8xf32>
    %4 = vector.shape_cast %3 : vector<8xf32> to vector<8x1xf32>
    %cst_3 = arith.constant 9.99999997E-7 : f32
    %5 = vector.broadcast %cst_3 : f32 to vector<8x1xf32>
    %6 = arith.addf %4, %5 : vector<8x1xf32>
    %7 = math.rsqrt %6 : vector<8x1xf32>
    %8 = vector.broadcast %7 : vector<8x1xf32> to vector<8x32xf32>
    %9 = arith.mulf %0, %8 : vector<8x32xf32>
    %10 = arith.mulf %1, %1 : vector<8x32xf32>
    %cst_4 = arith.constant dense<0.000000e+00> : vector<8xf32>
    %11 = vector.multi_reduction <add>, %10, %cst_4 [1] : vector<8x32xf32> to vector<8xf32>
    %12 = vector.shape_cast %11 : vector<8xf32> to vector<8x1xf32>
    %cst_5 = arith.constant 9.99999997E-7 : f32
    %13 = vector.broadcast %cst_5 : f32 to vector<8x1xf32>
    %14 = arith.addf %12, %13 : vector<8x1xf32>
    %15 = math.rsqrt %14 : vector<8x1xf32>
    %16 = vector.broadcast %15 : vector<8x1xf32> to vector<8x32xf32>
    %17 = arith.mulf %1, %16 : vector<8x32xf32>
    %18 = vector.extract_strided_slice %17 {offsets = [0, 0], sizes = [1, 32], strides = [1, 1]} : vector<8x32xf32> to vector<1x32xf32>
    %19 = tpu.concatenate %9, %18 in 0 : vector<8x32xf32>, vector<1x32xf32> -> vector<9x32xf32>
    %cst_6 = arith.constant dense<0.000000e+00> : vector<9x8xf32>
    %20 = tpu.matmul %19, %17, %cst_6 {dimension_numbers = #tpu.dot_dimension_numbers<[1], [1], [0], [0], [0, 0, 1, 0], [], []>} : vector<9x32xf32>, vector<8x32xf32>, vector<9x8xf32> -> vector<9x8xf32>
    %21 = vector.extract_strided_slice %20 {offsets = [0, 0], sizes = [8, 8], strides = [1, 1]} : vector<9x8xf32> to vector<8x8xf32>
    %22 = vector.extract_strided_slice %20 {offsets = [8, 0], sizes = [1, 8], strides = [1, 1]} : vector<9x8xf32> to vector<1x8xf32>
    %23 = vector.extract_strided_slice %21 {offsets = [0, 0], sizes = [8, 1], strides = [1, 1]} : vector<8x8xf32> to vector<8x1xf32>
    %24 = vector.shape_cast %23 : vector<8x1xf32> to vector<1x8x1xf32>
    %cst_7 = arith.constant dense<0.000000e+00> : vector<1xf32>
    %25 = vector.multi_reduction <add>, %24, %cst_7 [1, 2] : vector<1x8x1xf32> to vector<1xf32>
    %26 = vector.shape_cast %25 : vector<1xf32> to vector<1x1x1xf32>
    %27 = vector.extract %26[0, 0, 0] : f32 from vector<1x1x1xf32>
    %28 = vector.broadcast %27 : f32 to vector<1x1xf32>
    %29 = vector.shape_cast %21 : vector<8x8xf32> to vector<1x8x8xf32>
    %cst_8 = arith.constant dense<0.000000e+00> : vector<1xf32>
    %30 = vector.multi_reduction <add>, %29, %cst_8 [1, 2] : vector<1x8x8xf32> to vector<1xf32>
    %31 = vector.shape_cast %30 : vector<1xf32> to vector<1x1x1xf32>
    %32 = vector.extract %31[0, 0, 0] : f32 from vector<1x1x1xf32>
    %33 = vector.broadcast %32 : f32 to vector<1x1xf32>
    %cst_9 = arith.constant 8.000000e+00 : f32
    %34 = vector.broadcast %cst_9 : f32 to vector<1x1xf32>
    %35 = arith.divf %28, %34 : vector<1x1xf32>
    %36 = arith.subf %33, %28 : vector<1x1xf32>
    %cst_10 = arith.constant 5.600000e+01 : f32
    %37 = vector.broadcast %cst_10 : f32 to vector<1x1xf32>
    %38 = arith.divf %36, %37 : vector<1x1xf32>
    %cst_11 = arith.constant 1.000000e-01 : f32
    %39 = vector.broadcast %cst_11 : f32 to vector<1x8xf32>
    %40 = arith.divf %22, %39 : vector<1x8xf32>
    %cst_12 = arith.constant dense<0xFF800000> : vector<1xf32>
    %41 = vector.multi_reduction <maximumf>, %40, %cst_12 [1] : vector<1x8xf32> to vector<1xf32>
    %42 = vector.shape_cast %41 : vector<1xf32> to vector<1x1xf32>
    %43 = vector.broadcast %42 : vector<1x1xf32> to vector<1x8xf32>
    %44 = arith.subf %40, %43 : vector<1x8xf32>
    %45 = math.exp %44 : vector<1x8xf32>
    %cst_13 = arith.constant dense<0.000000e+00> : vector<1xf32>
    %46 = vector.multi_reduction <add>, %45, %cst_13 [1] : vector<1x8xf32> to vector<1xf32>
    %47 = vector.shape_cast %46 : vector<1xf32> to vector<1x1xf32>
    %48 = math.log %47 : vector<1x1xf32>
    %49 = vector.broadcast %48 : vector<1x1xf32> to vector<1x8xf32>
    %50 = arith.subf %44, %49 : vector<1x8xf32>
    %51 = math.exp %50 : vector<1x8xf32>
    %cst_14 = arith.constant 1.000000e-01 : f32
    %52 = vector.broadcast %cst_14 : f32 to vector<8x8xf32>
    %53 = arith.divf %21, %52 : vector<8x8xf32>
    %cst_15 = arith.constant dense<0xFF800000> : vector<8xf32>
    %54 = vector.multi_reduction <maximumf>, %53, %cst_15 [1] : vector<8x8xf32> to vector<8xf32>
    %55 = vector.shape_cast %54 : vector<8xf32> to vector<8x1xf32>
    %56 = vector.broadcast %55 : vector<8x1xf32> to vector<8x8xf32>
    %57 = arith.subf %53, %56 : vector<8x8xf32>
    %58 = math.exp %57 : vector<8x8xf32>
    %cst_16 = arith.constant dense<0.000000e+00> : vector<8xf32>
    %59 = vector.multi_reduction <add>, %58, %cst_16 [1] : vector<8x8xf32> to vector<8xf32>
    %60 = vector.shape_cast %59 : vector<8xf32> to vector<8x1xf32>
    %61 = math.log %60 : vector<8x1xf32>
    %62 = vector.broadcast %61 : vector<8x1xf32> to vector<8x8xf32>
    %63 = arith.subf %57, %62 : vector<8x8xf32>
    %64 = arith.mulf %51, %50 : vector<1x8xf32>
    %65 = vector.shape_cast %64 : vector<1x8xf32> to vector<1x1x8xf32>
    %cst_17 = arith.constant dense<0.000000e+00> : vector<1xf32>
    %66 = vector.multi_reduction <add>, %65, %cst_17 [1, 2] : vector<1x1x8xf32> to vector<1xf32>
    %67 = vector.shape_cast %66 : vector<1xf32> to vector<1x1x1xf32>
    %68 = vector.extract %67[0, 0, 0] : f32 from vector<1x1x1xf32>
    %69 = vector.broadcast %68 : f32 to vector<1x1xf32>
    %70 = vector.broadcast %51 : vector<1x8xf32> to vector<8x8xf32>
    %71 = arith.mulf %70, %63 : vector<8x8xf32>
    %cst_18 = arith.constant dense<0.000000e+00> : vector<8xf32>
    %72 = vector.multi_reduction <add>, %71, %cst_18 [1] : vector<8x8xf32> to vector<8xf32>
    %73 = vector.shape_cast %72 : vector<8xf32> to vector<8x1xf32>
    %cst_19 = arith.constant dense<0.000000e+00> : vector<1xf32>
    %74 = vector.multi_reduction <add>, %73, %cst_19 [0] : vector<8x1xf32> to vector<1xf32>
    %75 = vector.shape_cast %74 : vector<1xf32> to vector<1x1xf32>
    %cst_20 = arith.constant 8.000000e+00 : f32
    %76 = vector.broadcast %cst_20 : f32 to vector<1x1xf32>
    %77 = arith.divf %75, %76 : vector<1x1xf32>
    %78 = arith.subf %69, %77 : vector<1x1xf32>
    %79 = tpu.iota {dimensions = array<i32: 1>} : vector<1x128xi32>
    %c0_i32 = arith.constant 0 : i32
    %80 = vector.broadcast %c0_i32 : i32 to vector<1x128xi32>
    %81 = arith.cmpi eq, %79, %80 : vector<1x128xi32>
    %c1_i32 = arith.constant 1 : i32
    %82 = vector.broadcast %c1_i32 : i32 to vector<1x128xi32>
    %83 = arith.cmpi eq, %79, %82 : vector<1x128xi32>
    %84 = vector.shape_cast %38 : vector<1x1xf32> to vector<1x1xf32>
    %85 = vector.broadcast %84 : vector<1x1xf32> to vector<1x128xf32>
    %86 = vector.shape_cast %78 : vector<1x1xf32> to vector<1x1xf32>
    %87 = vector.broadcast %86 : vector<1x1xf32> to vector<1x128xf32>
    %88 = arith.select %83, %85, %87 : vector<1x128xi1>, vector<1x128xf32>
    %89 = vector.shape_cast %35 : vector<1x1xf32> to vector<1x1xf32>
    %90 = vector.broadcast %89 : vector<1x1xf32> to vector<1x128xf32>
    %91 = arith.select %81, %90, %88 : vector<1x128xi1>, vector<1x128xf32>
    %c0_21 = arith.constant 0 : index
    %c0_22 = arith.constant 0 : index
    %92 = vector.load %arg2[%c0_21, %c0_22] : memref<1x128xf32, #tpu.memory_space<vmem>>, vector<1x128xf32>
    tpu.vector_store %arg2[%c0_21, %c0_22], %91 {strides = array<i32>} : memref<1x128xf32, #tpu.memory_space<vmem>>, vector<1x128xf32>,
    return
  }
}

</mosaic_0001>

<bundles_post_ra>
// kernel: tpu_custom_call.1
= control target key start
LH: loop header
LB: loop body
LE: loop exit
PB: predicated region body
PF: predicated region fallthrough
CT: control target
= control target key end

     0   :  { %7 = vsyncpa [#allocation3], 0  ;;  %s388_s0 = inlined_call_operand.hbm [shape: f32[8,32], index: 0, kind: input, shape index: {}]   ;;  %s389_s1 = inlined_call_operand.hbm [shape: f32[8,32], index: 1, kind: input, shape index: {}]   ;;  %s390_s2 = inlined_call_operand.hbm [shape: f32[1,128], index: 2, kind: output, shape index: {}]  }
   0x1   :  { %8 = vsyncpa [#allocation6], 0 }
   0x2   :  { %9 = vsyncpa [#allocation4], 0  ;;  %s15_s11 = sshll.u32 %s388_s0, 4  ;;  %s345_s12 = smov [#allocation2]   ;;  %s16_s11 = int_to_ptr.hbm [resolvable:$true] %s15_s11 }
   0x3   :  { %s17_s13 = sshll.u32 %s345_s12, 4  ;;  %s26_s16 = sshll.u32 %s389_s1, 4  ;;  %s18_s13 = int_to_ptr.vmem [resolvable:$true] %s17_s13  ;;  %s27_s16 = int_to_ptr.hbm [resolvable:$true] %s26_s16 }
   0x4   :  { %20 = dma.hbm_to_vmem [thread:$0]  %s16_s11, 128, %s18_s13, [#allocation3]  }
   0x5   :  { %s346_s17 = smov [#allocation5]  }
   0x6   :  { %s28_s18 = sshll.u32 %s346_s17, 4  ;;  %s29_s18 = int_to_ptr.vmem [resolvable:$true] %s28_s18 }
   0x7   :  { %31 = dma.hbm_to_vmem [thread:$0]  %s27_s16, 128, %s29_s18, [#allocation6]  }
   0x8   :  { %339 = dma.done.wait [#allocation3], 128  }
   0x9   :  { %340 = vsyncadd [#allocation3], 4294967168 }
   0xa   :  { %341 = dma.done.wait [#allocation6], 128  }
   0xb   :  { %342 = vsyncadd [#allocation6], 4294967168  ;;  %v41_v0 = vld [vmem:[#allocation5] sm:$0xff]  ;;  %vm43_vm0 = vcmask 261120   ;;  %v40_v2 = vld [vmem:[#allocation2] sm:$0xff]  ;;  %vm153_vm8 = vcmask 57344  }
   0xc   :  { %v59_v1 = vmul.f32 %v41_v0, %v41_v0  ;;  %v42_v4 = vmul.f32 %v40_v2, %v40_v2  ;;  %v347_v26 = vmov 0.1   ;;  %vm104_vm9 = vcmask 7168   ;;  %s350_s20 = smov [#allocation7]   ;;  %s220_s24 = sshll.u32 %s390_s2, 4  ;;  %s221_s24 = int_to_ptr.hbm [resolvable:$true] %s220_s24 }
   0xd   :  { %vm116_vm10 = vcmask 64512   ;;  %s218_s21 = sshll.u32 %s350_s20, 4  ;;  %s219_s21 = int_to_ptr.vmem [resolvable:$true] %s218_s21 }
   0xe   :  { %v60_v3 = vsel %vm43_vm0, %v59_v1, 0.0  ;;  %v44_v5 = vsel %vm43_vm0, %v42_v4, 0.0 }
   0xf   :  { %61 = vadd.xlane.f32.xlu0 %v60_v3 }
  0x17   :  { %45 = vadd.xlane.f32.xlu0 %v44_v5 }
  0x82   :  { %v62_v6 = vpop.xlane.xlu0 %61 }
  0x83   :  { %v63_v7 = vadd.f32 1e-06, %v62_v6 }
  0x85   :  { %247 = vrsqrt.f32 %v63_v7  ;;  %vm70_vm2 = vweird.f32 %v63_v7 }
  0x8a   :  { %v46_v8 = vpop.xlane.xlu0 %45 }
  0x8b   :  { %v248_v9 = vpop.eup %247  ;;  %v47_v10 = vadd.f32 1e-06, %v46_v8 }
  0x8c   :  { %v65_v11 = vmul.f32 %v248_v9, %v63_v7  ;;  %vm71_vm1 = vweird.f32 %v248_v9 }
  0x8d   :  { %249 = vrsqrt.f32 %v47_v10  ;;  %vm72_vm3 = vmor %vm70_vm2, %vm71_vm1  ;;  %vm54_vm4 = vweird.f32 %v47_v10 }
  0x8e   :  { %v66_v12 = vmul.f32 %v248_v9, %v65_v11  ;;  %251 = vrcp.f32 %v347_v26 }
  0x90   :  { %v67_v13 = vmul.f32 0.5, %v66_v12 }
  0x92   :  { %v68_v14 = vsub.f32 1.5, %v67_v13 }
  0x93   :  { %v250_v15 = vpop.eup %249 }
  0x94   :  { %v49_v16 = vmul.f32 %v250_v15, %v47_v10  ;;  %v69_v17 = vmul.f32 %v248_v9, %v68_v14  ;;  %vm55_vm5 = vweird.f32 %v250_v15  ;;  %v252_v27 = vpop.eup %251 }
  0x95   :  { %vm56_vm6 = vmor %vm54_vm4, %vm55_vm5  ;;  %v146_v28 = vmul.f32 0.1, %v252_v27  ;;  %vm150_vm7 = vweird.f32 %v252_v27 }
  0x96   :  { %v50_v18 = vmul.f32 %v250_v15, %v49_v16  ;;  %v73_v19 = vsel %vm72_vm3, %v248_v9, %v69_v17 }
  0x97   :  { %v74_v20 = vmul.f32 %v73_v19, %v41_v0  ;;  %v147_v29 = vsub.f32 1.0, %v146_v28 }
  0x98   :  { %v51_v21 = vmul.f32 0.5, %v50_v18 }
  0x99   :  { %231 = vmatpush.xpose.msk.msra.mxu0 %vm43_vm0, %v74_v20  ;;  %234 = vmatpush.xpose.msk.msra.mxu1 %vm43_vm0, %v74_v20  ;;  %v148_v30 = vmul.f32 %v252_v27, %v147_v29 }
  0x9a   :  { %v52_v22 = vsub.f32 1.5, %v51_v21 }
  0x9b   :  { %v149_v31 = vadd.f32 %v252_v27, %v148_v30 }
  0x9c   :  { %233 = vmatmul.msk.f32.vlgmr.msra.gmra.mxu1 %vm43_vm0, %v74_v20  ;;  %v53_v23 = vmul.f32 %v250_v15, %v52_v22 }
  0x9d   :  { %v151_v32 = vsel %vm150_vm7, %v252_v27, %v149_v31 }
  0x9e   :  { %v57_v24 = vsel %vm56_vm6, %v250_v15, %v53_v23  ;;  %v348_v23 = vmov 8.0  }
  0x9f   :  { %v58_v25 = vmul.f32 %v57_v24, %v40_v2 }
  0xa1   :  { %232 = vmatmul.msk.f32.vlgmr.msra.gmra.mxu0 %vm43_vm0, %v58_v25  ;;  %v349_v25 = vmov 56.0  }
 0x119   :  { %v101_v33 = vpop.f32.mrf.mxu1 }
 0x11a   :  { %v152_v34 = vmul.f32 %v151_v32, %v101_v33 }
 0x11c   :  { %v154_v35 = vsel %vm153_vm8, %v152_v34, -inf }
 0x11d   :  { %155 = vmax.xlane.f32.xlu1 %v154_v35 }
 0x11e   :  { %v98_v36 = vpop.f32.mrf.mxu0 }
 0x11f   :  { %v168_v37 = vmul.f32 %v151_v32, %v98_v36  ;;  %v105_v38 = vsel %vm104_vm9, %v98_v36, 0.0  ;;  %v117_v57 = vsel %vm116_vm10, %v98_v36, 0.0 }
 0x120   :  { %106 = vadd.xlane.f32.xlu0 %v105_v38 }
 0x121   :  { %v169_v39 = vsel %vm116_vm10, %v168_v37, -inf }
 0x122   :  { %170 = vmax.xlane.f32.xlu2 %v169_v39  ;;  %v206_v39 = vlaneseq }
 0x190   :  { %v156_v40 = vpop.xlane.xlu1 %155 }
 0x191   :  { %v157_v41 = vsub.f32 %v152_v34, %v156_v40 }
 0x193   :  { %v158_v42 = vmul.f32 1.442695, %v157_v41  ;;  %v107_v43 = vpop.xlane.xlu0 %106 }
 0x194   :  { %v108_v44 = vrot.slane %v107_v43, 4 }
 0x195   :  { %253 = vpow2.f32 %v158_v42  ;;  %v171_v45 = vpop.xlane.xlu2 %170 }
 0x196   :  { %v172_v46 = vsub.f32 %v168_v37, %v171_v45  ;;  %v109_v47 = vadd.f32 %v108_v44, %v107_v43  ;;  %v207_v45 = vand.u32 127, %v206_v39 }
 0x198   :  { %v173_v48 = vmul.f32 1.442695, %v172_v46  ;;  %v110_v49 = vrot.slane %v109_v47, 2  ;;  %vm209_vm13 = vcmp.eq.s32.totalorder %v207_v45, 1  ;;  %vm208_vm14 = vcmp.eq.s32.totalorder %v207_v45, 0 }
 0x19a   :  { %255 = vpow2.f32 %v173_v48  ;;  %v111_v50 = vadd.f32 %v110_v49, %v109_v47 }
 0x19b   :  { %v254_v51 = vpop.eup %253 }
 0x19c   :  { %v160_v52 = vsel %vm153_vm8, %v254_v51, 0.0  ;;  %v112_v53 = vrot.slane %v111_v50, 1 }
 0x19d   :  { %161 = vadd.xlane.f32.xlu1 %v160_v52 }
 0x19e   :  { %v113_v54 = vadd.f32 %v112_v53, %v111_v50 }
 0x1a0   :  { %v256_v55 = vpop.eup %255  ;;  %235 = vpush %v113_v54 }
 0x1a1   :  { %v175_v56 = vsel %vm116_vm10, %v256_v55, 0.0 }
 0x1a2   :  { %176 = vadd.xlane.f32.xlu2 %v175_v56 }
 0x1a5   :  { %118 = vadd.xlane.f32.xlu1 %v117_v57 }
 0x1d1   :  { %s236_s0 = spop %235 }
 0x1d2   :  { %v115_v44 = vstv %s236_s0 }
 0x210   :  { %v162_v58 = vpop.xlane.xlu1 %161 }
 0x211   :  { %257 = vlog2.f32 %v162_v58 }
 0x215   :  { %v177_v59 = vpop.xlane.xlu2 %176 }
 0x216   :  { %259 = vlog2.f32 %v177_v59 }
 0x217   :  { %v258_v60 = vpop.eup %257 }
 0x218   :  { %v164_v61 = vmul.f32 0.6931472, %v258_v60  ;;  %v119_v62 = vpop.xlane.xlu1 %118 }
 0x219   :  { %v120_v63 = vrot.slane %v119_v62, 4 }
 0x21a   :  { %v165_v0 = vsub.f32 %v157_v41, %v164_v61 }
 0x21b   :  { %v121_v1 = vadd.f32 %v120_v63, %v119_v62 }
 0x21c   :  { %v166_v2 = vmul.f32 1.442695, %v165_v0  ;;  %v260_v4 = vpop.eup %259 }
 0x21d   :  { %v122_v3 = vrot.slane %v121_v1, 2  ;;  %v179_v6 = vmul.f32 0.6931472, %v260_v4 }
 0x21e   :  { %261 = vpow2.f32 %v166_v2 }
 0x21f   :  { %v123_v5 = vadd.f32 %v122_v3, %v121_v1  ;;  %v180_v10 = vsub.f32 %v172_v46, %v179_v6  ;;  %263 = vrcp.f32 %v348_v23 }
 0x220   :  { %265 = vrcp.f32 %v349_v25 }
 0x221   :  { %v124_v7 = vrot.slane %v123_v5, 1 }
 0x223   :  { %v125_v8 = vadd.f32 %v124_v7, %v123_v5 }
 0x224   :  { %v262_v9 = vpop.eup %261 }
 0x225   :  { %237 = vpush %v125_v8  ;;  %v181_v11 = vmul.f32 %v262_v9, %v165_v0  ;;  %v193_v12 = vperm.slane %v262_v9, 0  ;;  %v264_v27 = vpop.eup %263 }
 0x226   :  { %v266_v28 = vpop.eup %265  ;;  %v129_v30 = vmul.f32 8.0, %v264_v27  ;;  %vm133_vm11 = vweird.f32 %v264_v27 }
 0x227   :  { %v182_v13 = vsel %vm153_vm8, %v181_v11, 0.0  ;;  %v194_v14 = vmul.f32 %v193_v12, %v180_v10  ;;  %v138_v31 = vmul.f32 56.0, %v266_v28  ;;  %vm142_vm12 = vweird.f32 %v266_v28 }
 0x228   :  { %183 = vadd.xlane.f32.xlu2 %v182_v13  ;;  %v130_v33 = vsub.f32 1.0, %v129_v30 }
 0x229   :  { %v195_v15 = vsel %vm116_vm10, %v194_v14, 0.0  ;;  %v139_v34 = vsub.f32 1.0, %v138_v31 }
 0x22a   :  { %196 = vadd.xlane.f32.xlu0 %v195_v15  ;;  %v131_v36 = vmul.f32 %v264_v27, %v130_v33 }
 0x22b   :  { %v140_v37 = vmul.f32 %v266_v28, %v139_v34 }
 0x22c   :  { %v132_v40 = vadd.f32 %v264_v27, %v131_v36 }
 0x22d   :  { %v141_v42 = vadd.f32 %v266_v28, %v140_v37 }
 0x22e   :  { %v134_v47 = vsel %vm133_vm11, %v264_v27, %v132_v40 }
 0x22f   :  { %v143_v48 = vsel %vm142_vm12, %v266_v28, %v141_v42  ;;  %v135_v53 = vmul.f32 %v134_v47, %v115_v44 }
 0x256   :  { %s238_s1 = spop %237 }
 0x257   :  { %v127_v41 = vstv %s238_s1 }
 0x258   :  { %v136_v46 = vsub.f32 %v127_v41, %v115_v44 }
 0x25a   :  { %v144_v51 = vmul.f32 %v143_v48, %v136_v46 }
 0x29b   :  { %v184_v16 = vpop.xlane.xlu2 %183 }
 0x29c   :  { %v185_v17 = vrot.slane %v184_v16, 4 }
 0x29d   :  { %v197_v24 = vpop.xlane.xlu0 %196 }
 0x29e   :  { %v186_v18 = vadd.f32 %v185_v17, %v184_v16  ;;  %v198_v26 = vrot.slane %v197_v24, 4 }
 0x2a0   :  { %v187_v19 = vrot.slane %v186_v18, 2  ;;  %v199_v29 = vadd.f32 %v198_v26, %v197_v24 }
 0x2a2   :  { %v188_v20 = vadd.f32 %v187_v19, %v186_v18  ;;  %v200_v32 = vrot.slane %v199_v29, 2 }
 0x2a4   :  { %v189_v21 = vrot.slane %v188_v20, 1  ;;  %v201_v35 = vadd.f32 %v200_v32, %v199_v29 }
 0x2a6   :  { %v190_v22 = vadd.f32 %v189_v21, %v188_v20  ;;  %v202_v38 = vrot.slane %v201_v35, 1 }
 0x2a8   :  { %239 = vpush %v190_v22  ;;  %v203_v43 = vadd.f32 %v202_v38, %v201_v35 }
 0x2aa   :  { %v204_v49 = vmul.f32 %v203_v43, %v134_v47 }
 0x2d9   :  { %s240_s19 = spop %239 }
 0x2da   :  { %v192_v50 = vstv %s240_s19 }
 0x2db   :  { %v205_v52 = vsub.f32 %v192_v50, %v204_v49 }
 0x2dd   :  { %v210_v54 = vsel %vm209_vm13, %v144_v51, %v205_v52 }
 0x2de   :  { %v211_v55 = vsel %vm208_vm14, %v135_v53, %v210_v54 }
 0x2df   :  { %212 = vst [vmem:[#allocation7] sm:$0x1] %v211_v55 }
 0x2e0   :  { %223 = dma.vmem_to_hbm [thread:$0]  %s219_s21, 16, %s221_s24, [#allocation4]  }
 0x2e1   :  { %343 = dma.done.wait [#allocation4], 16  }
 0x2e2   :  { %344 = vsyncadd [#allocation4], 4294967280 }
 0x2e3   :  { %228 = vsyncpa [#allocation3], 1 }
 0x2e4   :  { %229 = vsyncpa [#allocation6], 1 }
 0x2e5   :  { %230 = vsyncpa [#allocation4], 1 }

</bundles_post_ra>
